<compile_context>
chip_gen: v5e
topology: v5e:2x2
jax: 0.10.0
libtpu: 0.0.40
codegen_flags: <defaults>
</compile_context>

<pallas_src>
import functools

import jax
import jax.numpy as jnp
import numpy as np
from jax.experimental import pallas as pl
from jax.experimental.pallas import tpu as pltpu


_PAD_ID = -(1 << 20)  # sentinel class id for padded target columns / batches


# ----------------------------------------------------------------------------
# Pallas kernel: batched matching cost matrix (G batch elements per grid step)
# ----------------------------------------------------------------------------
def _cost_kernel(tgt_ref, pred_ref, cost_ref, *, c_sizes, w_cls, w_reg,
                 use_softmax, dot_dtype):
    pred = pred_ref[...]                       # (G, TQ, C_all) f32
    tgt = tgt_ref[...]                         # (G, 6,  Tp)    f32
    g, _, c_all = pred.shape
    tp = tgt.shape[-1]
    c_total = sum(c_sizes)

    # Combined, weight-folded multi-hot selector:
    #   sel[g, c, t] = -w_h  when c == offset_h + class_id_h[g, t]
    # Rows belonging to the regression columns stay zero, so the regression
    # part of `pred` contributes nothing to the class matmul.
    # (Valid inputs have class ids in [0, C_h); out-of-range / sentinel ids —
    #  including the padding id — simply select nothing, i.e. zero class cost.)
    row = jax.lax.broadcasted_iota(jnp.int32, (g, c_all, tp), 1)
    sel = None
    off = 0
    for i, (c_h, w_h) in enumerate(zip(c_sizes, w_cls)):
        ids = tgt[:, i:i + 1, :].astype(jnp.int32) + off        # (G, 1, Tp)
        hot = (row == ids).astype(jnp.float32) * jnp.float32(-w_h)
        sel = hot if sel is None else sel + hot
        off += c_h

    # Single fused MXU matmul for all three (weighted) class gathers.
    cost = jnp.einsum("gqc,gct->gqt",
                      pred.astype(dot_dtype), sel.astype(dot_dtype),
                      preferred_element_type=jnp.float32)       # (G, TQ, Tp)

    if use_softmax:
        # -w * log_softmax(x)[tgt] = -w * x[tgt] + w * logsumexp(x).
        # The gather part is already in `cost`; add the per-query LSE term.
        off = 0
        corr = None
        for c_h, w_h in zip(c_sizes, w_cls):
            x = pred[:, :, off:off + c_h]
            m = jnp.max(x, axis=-1, keepdims=True)
            lse = m + jnp.log(jnp.sum(jnp.exp(x - m), axis=-1, keepdims=True))
            term = jnp.float32(w_h) * lse                        # (G, TQ, 1)
            corr = term if corr is None else corr + term
            off += c_h
        cost = cost + corr

    # L1 regression cost on the VPU: three static broadcast abs-diffs, no
    # zero-init accumulator / extra temporaries.
    pr = pred[:, :, c_total:c_total + 3]                         # (G, TQ, 3)
    tr = tgt[:, 3:6, :]                                          # (G, 3,  Tp)
    c_reg = (jnp.abs(pr[:, :, 0:1] - tr[:, 0:1, :])
             + jnp.abs(pr[:, :, 1:2] - tr[:, 1:2, :])
             + jnp.abs(pr[:, :, 2:3] - tr[:, 2:3, :]))           # (G, TQ, Tp)

    cost_ref[...] = cost + jnp.float32(w_reg) * c_reg


def _round_up(x, m):
    return ((x + m - 1) // m) * m


def _choose_group_size(batch, per_batch_bytes, budget_bytes=6 << 20):
    """Batch elements per grid step: amortize per-step overhead, stay in VMEM."""
    g = max(1, min(batch, budget_bytes // max(per_batch_bytes, 1)))
    if batch >= 2:
        # Keep at least 2 grid steps so v7x's second TensorCore gets work.
        g = min(g, (batch + 1) // 2)
    return int(g)


def matching_cost_matrix(pred_note, pred_inst, pred_pitch, pred_reg,
                         tgt_note, tgt_inst, tgt_pitch, tgt_reg, *,
                         w_note=1.0, w_inst=1.0, w_pitch=1.0, w_reg=1.0,
                         use_softmax=False, class_dot_dtype=jnp.bfloat16):
    """Returns the [B, Q, T] matching cost matrix computed by the Pallas kernel.

    pred_*:   [B, Q, C_*] / [B, Q, 3] float predictions.
    tgt_*:    [B, T] int class ids; tgt_reg: [B, 3, T] float (start/dur/vel).
    """
    B, Q, C_note = pred_note.shape
    C_inst = pred_inst.shape[-1]
    C_pitch = pred_pitch.shape[-1]
    assert pred_reg.shape[-1] == 3
    T = tgt_note.shape[-1]
    c_sizes = (C_note, C_inst, C_pitch)
    C_total = sum(c_sizes)
    C_all = C_total + 3

    # Lane-dense target axis: pad T up to a multiple of 128.
    Tp = _round_up(max(T, 1), 128)

    # Pack predictions into one (B, Q, C_all) slab: [note | inst | pitch | reg].
    pred_packed = jnp.concatenate(
        [pred_note.astype(jnp.float32), pred_inst.astype(jnp.float32),
         pred_pitch.astype(jnp.float32), pred_reg.astype(jnp.float32)], axis=-1)

    # Pack targets into one (B, 6, Tp) slab:
    # rows 0..2 = class ids (as f32, exact for small ints), rows 3..5 = reg.
    ids = jnp.stack([tgt_note, tgt_inst, tgt_pitch], axis=1).astype(jnp.float32)
    reg = tgt_reg.astype(jnp.float32)
    if Tp > T:
        ids = jnp.pad(ids, ((0, 0), (0, 0), (0, Tp - T)),
                      constant_values=float(_PAD_ID))
        reg = jnp.pad(reg, ((0, 0), (0, 0), (0, Tp - T)))
    tgt_packed = jnp.concatenate([ids, reg], axis=1)             # (B, 6, Tp)

    # Batch grouping (G per grid step) with padding of B up to a full group.
    per_batch_bytes = 4 * (Q * C_all + 6 * Tp + Q * Tp + 2 * C_all * Tp)
    G = _choose_group_size(B, per_batch_bytes)
    num_groups = -(-B // G)
    B_pad = num_groups * G
    if B_pad > B:
        pred_packed = jnp.pad(pred_packed, ((0, B_pad - B), (0, 0), (0, 0)))
        pad_tgt = jnp.concatenate(
            [jnp.full((B_pad - B, 3, Tp), float(_PAD_ID), jnp.float32),
             jnp.zeros((B_pad - B, 3, Tp), jnp.float32)], axis=1)
        tgt_packed = jnp.concatenate([tgt_packed, pad_tgt], axis=0)

    # When B == 1 there is only one batch group; split Q into 2 parallel tiles
    # so v7x's two TensorCores both run (no effect on v5e/v6e correctness).
    nq = 2 if (num_groups == 1 and Q >= 16 and Q % 16 == 0) else 1
    TQ = Q // nq

    kernel = functools.partial(
        _cost_kernel, c_sizes=c_sizes,
        w_cls=(float(w_note), float(w_inst), float(w_pitch)),
        w_reg=float(w_reg), use_softmax=bool(use_softmax),
        dot_dtype=class_dot_dtype)

    cost = pl.pallas_call(
        kernel,
        out_shape=jax.ShapeDtypeStruct((B_pad, Q, Tp), jnp.float32),
        grid_spec=pltpu.PrefetchScalarGridSpec(
            num_scalar_prefetch=0,
            grid=(num_groups, nq),
            in_specs=[
                pl.BlockSpec((G, 6, Tp), lambda g, q: (g, 0, 0)),     # targets
                pl.BlockSpec((G, TQ, C_all), lambda g, q: (g, q, 0)),  # preds
            ],
            out_specs=pl.BlockSpec((G, TQ, Tp), lambda g, q: (g, q, 0)),
        ),
        compiler_params=pltpu.CompilerParams(
            dimension_semantics=("parallel", "parallel")),
    )(tgt_packed, pred_packed)

    return cost[:B, :, :T]


# ----------------------------------------------------------------------------
# Host-side Hungarian assignment (shortest augmenting path / Jonker-Volgenant).
# TODO(synk): linear_sum_assignment is sequential & data-dependent -> host-side.
# ----------------------------------------------------------------------------
def linear_sum_assignment_np(cost):
    cost = np.asarray(cost, dtype=np.float64)
    transposed = False
    if cost.shape[0] > cost.shape[1]:
        cost = cost.T
        transposed = True
    n, m = cost.shape  # n <= m
    INF = float("inf")
    a = np.zeros((n + 1, m + 1))
    a[1:, 1:] = cost
    u = np.zeros(n + 1)
    v = np.zeros(m + 1)
    p = np.zeros(m + 1, dtype=np.int64)
    way = np.zeros(m + 1, dtype=np.int64)
    for i in range(1, n + 1):
        p[0] = i
        j0 = 0
        minv = np.full(m + 1, INF)
        used = np.zeros(m + 1, dtype=bool)
        while True:
            used[j0] = True
            i0 = p[j0]
            delta = INF
            j1 = -1
            for j in range(1, m + 1):
                if not used[j]:
                    cur = a[i0, j] - u[i0] - v[j]
                    if cur < minv[j]:
                        minv[j] = cur
                        way[j] = j0
                    if minv[j] < delta:
                        delta = minv[j]
                        j1 = j
            for j in range(m + 1):
                if used[j]:
                    u[p[j]] += delta
                    v[j] -= delta
                else:
                    minv[j] -= delta
            j0 = j1
            if p[j0] == 0:
                break
        while True:
            j1 = way[j0]
            p[j0] = p[j1]
            j0 = j1
            if j0 == 0:
                break
    rows, cols = [], []
    for j in range(1, m + 1):
        if p[j] != 0:
            rows.append(p[j] - 1)
            cols.append(j - 1)
    rows = np.asarray(rows, dtype=np.int64)
    cols = np.asarray(cols, dtype=np.int64)
    if transposed:
        rows, cols = cols, rows
    order = np.argsort(rows, kind="stable")
    return rows[order], cols[order]


def hungarian_matcher(outputs, targets, *, cost_note_type=1.0, cost_instrument=1.0,
                      cost_pitch=1.0, cost_regression=1.0, use_softmax=False,
                      class_dot_dtype=jnp.bfloat16):
    """Forward pass of HungarianMatcher.

    outputs: dict with 'pred_note_type' [B,Q,Cn], 'pred_instrument' [B,Q,Ci],
             'pred_pitch' [B,Q,Cp], 'pred_regression' [B,Q,3]
    targets: dict with 'note_type','instrument','pitch' [B,T] (int) and
             'start_time','duration','velocity' [B,T] (float)
    Returns list of B tuples (pred_indices, target_indices) as int64 numpy arrays.
    """
    assert (cost_note_type != 0 or cost_instrument != 0 or cost_pitch != 0
            or cost_regression != 0), "All costs can't be 0"

    tgt_note = jnp.asarray(targets["note_type"]).astype(jnp.int32)
    tgt_inst = jnp.asarray(targets["instrument"]).astype(jnp.int32)
    tgt_pitch = jnp.asarray(targets["pitch"]).astype(jnp.int32)
    tgt_reg = jnp.stack(
        [jnp.asarray(targets["start_time"]), jnp.asarray(targets["duration"]),
         jnp.asarray(targets["velocity"])], axis=1).astype(jnp.float32)  # [B,3,T]

    T = tgt_note.shape[-1]
    if T == 0:
        B = tgt_note.shape[0]
        return [(np.empty(0, dtype=np.int64), np.empty(0, dtype=np.int64))
                for _ in range(B)]

    C = matching_cost_matrix(
        jnp.asarray(outputs["pred_note_type"]).astype(jnp.float32),
        jnp.asarray(outputs["pred_instrument"]).astype(jnp.float32),
        jnp.asarray(outputs["pred_pitch"]).astype(jnp.float32),
        jnp.asarray(outputs["pred_regression"]).astype(jnp.float32),
        tgt_note, tgt_inst, tgt_pitch, tgt_reg,
        w_note=cost_note_type, w_inst=cost_instrument,
        w_pitch=cost_pitch, w_reg=cost_regression,
        use_softmax=use_softmax, class_dot_dtype=class_dot_dtype)
    C = jax.block_until_ready(C)
    C_np = np.asarray(C)

    all_indices = []
    for b in range(C_np.shape[0]):
        row, col = linear_sum_assignment_np(C_np[b])
        all_indices.append((row, col))
    return all_indices


# ----------------------------------------------------------------------------
# Pure-JAX reference for the cost matrix (correctness check of the kernel).
# ----------------------------------------------------------------------------
def _cost_reference(pn, pi, pp, pr, tn, ti, tp_, tr,
                    w_note, w_inst, w_pitch, w_reg, use_softmax):
    def cls(pred, tgt):  # pred [B,Q,C], tgt [B,T] -> [B,Q,T]
        if use_softmax:
            pred = jax.nn.log_softmax(pred, axis=-1)
        return -jax.vmap(lambda p, t: p[:, t])(pred, tgt)

    c_note = cls(pn, tn)
    c_inst = cls(pi, ti)
    c_pitch = cls(pp, tp_)
    c_reg = jnp.sum(
        jnp.abs(pr[:, :, None, :] - jnp.transpose(tr, (0, 2, 1))[:, None, :, :]),
        axis=-1)
    return (w_note * c_note + w_inst * c_inst + w_pitch * c_pitch
            + w_reg * c_reg)


if __name__ == "__main__":
    def make_inputs(key, B, Q, T, Cn=4, Ci=8, Cp=128):
        ks = jax.random.split(key, 10)
        outputs = {
            "pred_note_type":  jax.random.normal(ks[0], (B, Q, Cn), jnp.float32),
            "pred_instrument": jax.random.normal(ks[1], (B, Q, Ci), jnp.float32),
            "pred_pitch":      jax.random.normal(ks[2], (B, Q, Cp), jnp.float32),
            "pred_regression": jax.random.uniform(ks[3], (B, Q, 3), jnp.float32),
        }
        targets = {
            "note_type":  jax.random.randint(ks[4], (B, T), 0, Cn),
            "instrument": jax.random.randint(ks[5], (B, T), 0, Ci),
            "pitch":      jax.random.randint(ks[6], (B, T), 0, Cp),
            "start_time": jax.random.uniform(ks[7], (B, T), jnp.float32),
            "duration":   jax.random.uniform(ks[8], (B, T), jnp.float32),
            "velocity":   jax.random.uniform(ks[9], (B, T), jnp.float32),
        }
        return outputs, targets

    def check(outputs, targets, *, use_softmax, dtype, rtol, atol):
        tgt_reg = jnp.stack([targets["start_time"], targets["duration"],
                             targets["velocity"]], axis=1).astype(jnp.float32)
        C = matching_cost_matrix(
            outputs["pred_note_type"], outputs["pred_instrument"],
            outputs["pred_pitch"], outputs["pred_regression"],
            targets["note_type"].astype(jnp.int32),
            targets["instrument"].astype(jnp.int32),
            targets["pitch"].astype(jnp.int32), tgt_reg,
            use_softmax=use_softmax, class_dot_dtype=dtype)
        C = jax.block_until_ready(C)
        C_ref = _cost_reference(
            outputs["pred_note_type"], outputs["pred_instrument"],
            outputs["pred_pitch"], outputs["pred_regression"],
            targets["note_type"], targets["instrument"], targets["pitch"],
            tgt_reg, 1.0, 1.0, 1.0, 1.0, use_softmax)
        np.testing.assert_allclose(np.asarray(C), np.asarray(C_ref),
                                   rtol=rtol, atol=atol)

    root = jax.random.PRNGKey(0)
    k_main, k_b3, k_b1 = jax.random.split(root, 3)

    # Main case: B=2, Q=16, T=8, class heads (4, 8, 128).
    outputs, targets = make_inputs(k_main, B=2, Q=16, T=8)
    # f32 MXU path (strict), default bf16 MXU path (loose), log_softmax path.
    check(outputs, targets, use_softmax=False, dtype=jnp.float32,
          rtol=1e-4, atol=1e-4)
    check(outputs, targets, use_softmax=False, dtype=jnp.bfloat16,
          rtol=5e-2, atol=5e-2)
    check(outputs, targets, use_softmax=True, dtype=jnp.float32,
          rtol=1e-3, atol=1e-3)

    # Exercise batch grouping + batch padding (B=3 -> G=2, B_pad=4)
    # and the Q-split path used when B == 1.
    o3, t3 = make_inputs(k_b3, B=3, Q=16, T=8)
    check(o3, t3, use_softmax=False, dtype=jnp.float32, rtol=1e-4, atol=1e-4)
    o1, t1 = make_inputs(k_b1, B=1, Q=16, T=8)
    check(o1, t1, use_softmax=False, dtype=jnp.float32, rtol=1e-4, atol=1e-4)

    # Full forward pass (Pallas cost matrix + host Hungarian assignment).
    indices = hungarian_matcher(outputs, targets)
    assert len(indices) == 2
    T = 8
    for row, col in indices:
        assert row.shape == (T,) and col.shape == (T,)
        assert row.dtype == np.int64 and col.dtype == np.int64
        assert len(set(row.tolist())) == T and len(set(col.tolist())) == T

    print("KERNEL_OK")
</pallas_src>

<mosaic_0001>
module attributes {stable_mosaic.version = 11 : i64} {
  func.func @_cost_kernel(%arg0: i32, %arg1: i32, %arg2: memref<1x6x128xf32, #tpu.memory_space<vmem>>, %arg3: memref<1x16x143xf32, #tpu.memory_space<vmem>>, %arg4: memref<1x16x128xf32, #tpu.memory_space<vmem>>) attributes {dimension_semantics = [#tpu.dimension_semantics<parallel>, #tpu.dimension_semantics<parallel>], iteration_bounds = array<i64: 2, 1>, scalar_prefetch = 0 : i64, scratch_operands = 0 : i64, tpu.core_type = #tpu.core_type<tc>, window_params = [{transform_indices = @transform_0, window_bounds = array<i64: 1, 6, 128>}, {transform_indices = @transform_1, window_bounds = array<i64: 1, 16, 143>}, {transform_indices = @transform_2, window_bounds = array<i64: 1, 16, 128>}]} {
    %c0 = arith.constant 0 : index
    %c0_0 = arith.constant 0 : index
    %c0_1 = arith.constant 0 : index
    %0 = vector.load %arg3[%c0, %c0_0, %c0_1] : memref<1x16x143xf32, #tpu.memory_space<vmem>>, vector<1x16x143xf32>
    %c0_2 = arith.constant 0 : index
    %c0_3 = arith.constant 0 : index
    %c0_4 = arith.constant 0 : index
    %1 = vector.load %arg2[%c0_2, %c0_3, %c0_4] : memref<1x6x128xf32, #tpu.memory_space<vmem>>, vector<1x6x128xf32>
    %2 = tpu.iota {dimensions = array<i32: 1>} : vector<1x143x128xi32>
    %3 = vector.extract_strided_slice %1 {offsets = [0, 0, 0], sizes = [1, 1, 128], strides = [1, 1, 1]} : vector<1x6x128xf32> to vector<1x1x128xf32>
    %4 = arith.fptosi %3 : vector<1x1x128xf32> to vector<1x1x128xi32>
    %c0_i32 = arith.constant 0 : i32
    %5 = vector.broadcast %c0_i32 : i32 to vector<1x1x128xi32>
    %6 = arith.addi %4, %5 : vector<1x1x128xi32>
    %7 = vector.broadcast %6 : vector<1x1x128xi32> to vector<1x143x128xi32>
    %8 = arith.cmpi eq, %2, %7 : vector<1x143x128xi32>
    %9 = arith.extui %8 : vector<1x143x128xi1> to vector<1x143x128xi32>
    %10 = arith.sitofp %9 : vector<1x143x128xi32> to vector<1x143x128xf32>
    %cst = arith.constant -1.000000e+00 : f32
    %11 = vector.broadcast %cst : f32 to vector<1x143x128xf32>
    %12 = arith.mulf %10, %11 : vector<1x143x128xf32>
    %13 = vector.extract_strided_slice %1 {offsets = [0, 1, 0], sizes = [1, 1, 128], strides = [1, 1, 1]} : vector<1x6x128xf32> to vector<1x1x128xf32>
    %14 = arith.fptosi %13 : vector<1x1x128xf32> to vector<1x1x128xi32>
    %c4_i32 = arith.constant 4 : i32
    %15 = vector.broadcast %c4_i32 : i32 to vector<1x1x128xi32>
    %16 = arith.addi %14, %15 : vector<1x1x128xi32>
    %17 = vector.broadcast %16 : vector<1x1x128xi32> to vector<1x143x128xi32>
    %18 = arith.cmpi eq, %2, %17 : vector<1x143x128xi32>
    %19 = arith.extui %18 : vector<1x143x128xi1> to vector<1x143x128xi32>
    %20 = arith.sitofp %19 : vector<1x143x128xi32> to vector<1x143x128xf32>
    %cst_5 = arith.constant -1.000000e+00 : f32
    %21 = vector.broadcast %cst_5 : f32 to vector<1x143x128xf32>
    %22 = arith.mulf %20, %21 : vector<1x143x128xf32>
    %23 = arith.addf %12, %22 : vector<1x143x128xf32>
    %24 = vector.extract_strided_slice %1 {offsets = [0, 2, 0], sizes = [1, 1, 128], strides = [1, 1, 1]} : vector<1x6x128xf32> to vector<1x1x128xf32>
    %25 = arith.fptosi %24 : vector<1x1x128xf32> to vector<1x1x128xi32>
    %c12_i32 = arith.constant 12 : i32
    %26 = vector.broadcast %c12_i32 : i32 to vector<1x1x128xi32>
    %27 = arith.addi %25, %26 : vector<1x1x128xi32>
    %28 = vector.broadcast %27 : vector<1x1x128xi32> to vector<1x143x128xi32>
    %29 = arith.cmpi eq, %2, %28 : vector<1x143x128xi32>
    %30 = arith.extui %29 : vector<1x143x128xi1> to vector<1x143x128xi32>
    %31 = arith.sitofp %30 : vector<1x143x128xi32> to vector<1x143x128xf32>
    %cst_6 = arith.constant -1.000000e+00 : f32
    %32 = vector.broadcast %cst_6 : f32 to vector<1x143x128xf32>
    %33 = arith.mulf %31, %32 : vector<1x143x128xf32>
    %34 = arith.addf %23, %33 : vector<1x143x128xf32>
    "tpu.trace_start"() <{level = 10 : i32, message = "gqc,gct->gqt"}> : () -> ()
    %cst_7 = arith.constant dense<0.000000e+00> : vector<1x16x128xf32>
    %35 = tpu.matmul %0, %34, %cst_7 {dimension_numbers = #tpu.dot_dimension_numbers<[2], [1], [1], [2], [0, 0, 0, 1, 1, 2], [0], [0]>} : vector<1x16x143xf32>, vector<1x143x128xf32>, vector<1x16x128xf32> -> vector<1x16x128xf32>
    "tpu.trace_stop"() : () -> ()
    %36 = vector.extract_strided_slice %0 {offsets = [0, 0, 140], sizes = [1, 16, 3], strides = [1, 1, 1]} : vector<1x16x143xf32> to vector<1x16x3xf32>
    %37 = vector.extract_strided_slice %1 {offsets = [0, 3, 0], sizes = [1, 3, 128], strides = [1, 1, 1]} : vector<1x6x128xf32> to vector<1x3x128xf32>
    %38 = vector.extract_strided_slice %36 {offsets = [0, 0, 0], sizes = [1, 16, 1], strides = [1, 1, 1]} : vector<1x16x3xf32> to vector<1x16x1xf32>
    %39 = vector.extract_strided_slice %37 {offsets = [0, 0, 0], sizes = [1, 1, 128], strides = [1, 1, 1]} : vector<1x3x128xf32> to vector<1x1x128xf32>
    %40 = vector.broadcast %38 : vector<1x16x1xf32> to vector<1x16x128xf32>
    %41 = vector.broadcast %39 : vector<1x1x128xf32> to vector<1x16x128xf32>
    %42 = arith.subf %40, %41 : vector<1x16x128xf32>
    %43 = math.absf %42 : vector<1x16x128xf32>
    %44 = vector.extract_strided_slice %36 {offsets = [0, 0, 1], sizes = [1, 16, 1], strides = [1, 1, 1]} : vector<1x16x3xf32> to vector<1x16x1xf32>
    %45 = vector.extract_strided_slice %37 {offsets = [0, 1, 0], sizes = [1, 1, 128], strides = [1, 1, 1]} : vector<1x3x128xf32> to vector<1x1x128xf32>
    %46 = vector.broadcast %44 : vector<1x16x1xf32> to vector<1x16x128xf32>
    %47 = vector.broadcast %45 : vector<1x1x128xf32> to vector<1x16x128xf32>
    %48 = arith.subf %46, %47 : vector<1x16x128xf32>
    %49 = math.absf %48 : vector<1x16x128xf32>
    %50 = arith.addf %43, %49 : vector<1x16x128xf32>
    %51 = vector.extract_strided_slice %36 {offsets = [0, 0, 2], sizes = [1, 16, 1], strides = [1, 1, 1]} : vector<1x16x3xf32> to vector<1x16x1xf32>
    %52 = vector.extract_strided_slice %37 {offsets = [0, 2, 0], sizes = [1, 1, 128], strides = [1, 1, 1]} : vector<1x3x128xf32> to vector<1x1x128xf32>
    %53 = vector.broadcast %51 : vector<1x16x1xf32> to vector<1x16x128xf32>
    %54 = vector.broadcast %52 : vector<1x1x128xf32> to vector<1x16x128xf32>
    %55 = arith.subf %53, %54 : vector<1x16x128xf32>
    %56 = math.absf %55 : vector<1x16x128xf32>
    %57 = arith.addf %50, %56 : vector<1x16x128xf32>
    %cst_8 = arith.constant 1.000000e+00 : f32
    %58 = vector.broadcast %cst_8 : f32 to vector<1x16x128xf32>
    %59 = arith.mulf %58, %57 : vector<1x16x128xf32>
    %60 = arith.addf %35, %59 : vector<1x16x128xf32>
    %c0_9 = arith.constant 0 : index
    %c0_10 = arith.constant 0 : index
    %c0_11 = arith.constant 0 : index
    %61 = vector.load %arg4[%c0_9, %c0_10, %c0_11] : memref<1x16x128xf32, #tpu.memory_space<vmem>>, vector<1x16x128xf32>
    tpu.vector_store %arg4[%c0_9, %c0_10, %c0_11], %60 {strides = array<i32>} : memref<1x16x128xf32, #tpu.memory_space<vmem>>, vector<1x16x128xf32>,
    return
  }
  func.func @transform_0(%arg0: i32, %arg1: i32) -> (i32, i32, i32) {
    %c0_i32 = arith.constant 0 : i32
    %c0_i32_0 = arith.constant 0 : i32
    %c0_i32_1 = arith.constant 0 : i32
    return %arg0, %c0_i32, %c0_i32_0 : i32, i32, i32
  }
  func.func @transform_1(%arg0: i32, %arg1: i32) -> (i32, i32, i32) {
    %c0_i32 = arith.constant 0 : i32
    %c0_i32_0 = arith.constant 0 : i32
    return %arg0, %arg1, %c0_i32 : i32, i32, i32
  }
  func.func @transform_2(%arg0: i32, %arg1: i32) -> (i32, i32, i32) {
    %c0_i32 = arith.constant 0 : i32
    %c0_i32_0 = arith.constant 0 : i32
    return %arg0, %arg1, %c0_i32 : i32, i32, i32
  }
}

</mosaic_0001>

<bundles_post_ra>
// kernel: tpu_custom_call.1
= control target key start
LH: loop header
LB: loop body
LE: loop exit
PB: predicated region body
PF: predicated region fallthrough
CT: control target
= control target key end

     0   :  { %7 = vsyncpa [#allocation3], 0  ;;  %s1348_s0 = inlined_call_operand.vmem [shape: f32[2,6,128], index: 0, kind: input, shape index: {}]   ;;  %s1349_s1 = inlined_call_operand.hbm [shape: f32[2,16,143], index: 1, kind: input, shape index: {}]   ;;  %s1350_s2 = inlined_call_operand.hbm [shape: f32[2,16,128], index: 2, kind: output, shape index: {}]  }
   0x1   :  { %9 = vsyncpa [#allocation3 + $0x1], 0 }
   0x2   :  { %10 = vsyncpa [#allocation4], 0 }
   0x3   :  { %12 = vsyncpa [#allocation4 + $0x1], 0  ;;  %s1010_s9 = smov 0   ;;  %s1012_s10 = smov 0  }
   0x4   :  { %s1014_s11 = smov 0   ;;  %s1016_s12 = smov 0  }
   0x5   :  { %s1018_s13 = smov 0   ;;  %s1020_s14 = smov 0  }
   0x6 LB: > { %s703_s15 = sadd.s32 4294967295, %s985_s14   ;;  %s704_s16 = sadd.s32 4294967294, %s985_s14   ;;  %s985_s14 = sphi %s1020_s14, %s18_s14   ;;  %s981_s13 = sphi %s1018_s13, %s1359_s13   ;;  %s977_s12 = sphi %s1016_s12, %s1358_s12   ;;  %s973_s11 = sphi %s1014_s11, %s1357_s11   ;;  %s969_s10 = sphi %s1012_s10, %s1356_s10   ;;  %s965_s9 = sphi %s1010_s9, %s1355_s9  }
   0x7   : > { %s30_s17 = sadd.s32 1, %s981_s13  ;;  %s65_s18 = sadd.s32 1, %s973_s11 }
   0x8   : > { %p32_p0 = scmp.ge.s32.totalorder %s30_s17, 2  ;;  %p72_p1 = scmp.ne.s32.totalorder %s973_s11, %s969_s10 }
   0x9   : > { %p73_p2 = scmp.eq.s32.totalorder %s985_s14, 0  ;;  %p78_p3 = scmp.ne.s32.totalorder %s969_s10, %s965_s9 }
   0xa   : > { %s1361_s17 = smov (%p32_p0, %s30_s17), 0  ;;  %p79_p5 = scmp.eq.s32.totalorder %s703_s15, 0 }
   0xb   : > { %p1051_p4 = por %p73_p2, %p72_p1  ;;  %s60_s20 = ssub.s32 %s981_s13, %s1361_s17 }
   0xc   : > { %p104_p6 = scmp.eq.s32.totalorder %s703_s15, 1  ;;  %p63_p7 = scmp.eq.s32.totalorder %s60_s20, 0 }
   0xd   : > { %p1057_p8 = por %p79_p5, %p78_p3  ;;  %p110_p10 = scmp.eq.s32.totalorder %s704_s16, 1 }
   0xe   : > { %p1061_p9 = por %p104_p6, %p72_p1  ;;  %p706_p12 = scmp.ge.s32.totalorder %s985_s14, 2 }
   0xf   : > { %s1066_s23 = scalar_select %p63_p7, %s973_s11, %s65_s18  }
  0x10   : > { %p1068_p11 = por %p110_p10, %p78_p3  ;;  %p811_p13 = scmp.lt.s32.totalorder %s985_s14, 2 }
  0x11   : > { %s137_s25 = sand.u32 1, %s973_s11   ;;  %s776_s27 = sshll.u32 %s981_s13, 5 }
  0x12   : > { %s707_s26 = sshll.u32 %s137_s25, 5  ;;  %s149_s30 = scalar_lea.hbm %s1349_s1, %s776_s27 }
  0x13   : > { %s141_s3 = scalar_lea.vmem [#allocation2], %s707_s26  ;;  %s150_s5 = sshll.u32 %s149_s30, 4  ;;  %s151_s5 = int_to_ptr.hbm [resolvable:$true] %s150_s5 }
  0x14   : > { %s152_s4 = sshll.u32 %s141_s3, 4  ;;  %p804_p0 = pnand %p811_p13, %p1051_p4  ;;  %s153_s4 = int_to_ptr.vmem [resolvable:$true] %s152_s4 }
  0x15   : > { %p710_p1 = scmp.ge.s32.totalorder %s985_s14, 1  ;;  %s138_s6 = scalar_lea.sflag [#allocation3], %s137_s25 }
  0x16   : > { %s987_s7 = smov 256   ;;  %s988_s8 = smov 16  }
  0x17   : > { %806 = dma.hbm_to_vmem [thread:$0]  (!%p804_p0), %s151_s5, 512, %s153_s4, %s138_s6, %s987_s7, %s987_s7, %s988_s8  }
  0x18   : > { %p160_p2 = scmp.lt.s32.totalorder %s985_s14, 3 }
  0x1a   : > { %p161_p3 = pnand %p710_p1, %p160_p2 }
  0x1b   : > { %s1084_s15 = sand.u32 (!%p161_p3), 1, %s969_s10  }
  0x1c   : > { %164 = sbr.rel (%p161_p3) target bundleno = 246 (0xf6), region = 28  ;;  %s711_s16 = sshll.u32 (!%p161_p3), %s1084_s15, 5 }
  0x1d   : > { %s167_s18 = scalar_lea.sflag (!%p161_p3), [#allocation3], %s1084_s15  ;;  %s1088_s20 = scalar_lea.vmem (!%p161_p3), [#allocation2], %s711_s16 }
  0x21   : > { %956 = dma.done.wait (%p1057_p8), %s167_s18, 512  }
  0x22   : > { %958 = vsyncadd (%p1057_p8), %s167_s18, 4294966784  ;;  %p196_p4 = scmp.lt.s32.totalorder %s977_s12, 1  ;;  %v207_v0 = vlaneseq  ;;  %v989_v25 = vmov 0.0   ;;  %s712_s21 = sshll.u32 %s1084_s15, 4 }
  0x23   : > { %s777_s29 = sshll.u32 %s977_s12, 4  ;;  %s195_s5 = scalar_lea.vmem [#allocation5], %s712_s21 }
  0x24   : > { %s197_s19 = scalar_select %p196_p4, %s977_s12, 1  ;;  %v1099_v1 = vshrl.u32 %v207_v0, 7 }
  0x25   : > { %s600_s4 = scalar_lea.hbm %s1350_s2, %s777_s29  ;;  %s601_s6 = sshll.u32 %s195_s5, 4  ;;  %s602_s6 = int_to_ptr.vmem [resolvable:$true] %s601_s6 }
  0x26   : > { %s713_s25 = sshll.u32 %s197_s19, 3  ;;  %v223_v6 = vadd.s32 120, %v1099_v1  ;;  %v222_v8 = vadd.s32 112, %v1099_v1  ;;  %v221_v9 = vadd.s32 104, %v1099_v1  ;;  %v220_v10 = vadd.s32 96, %v1099_v1  ;;  %s603_s7 = sshll.u32 %s600_s4, 4  ;;  %s604_s7 = int_to_ptr.hbm [resolvable:$true] %s603_s7 }
  0x27   : > { %s199_s28 = scalar_lea.vmem %s1348_s0, %s713_s25  ;;  %v1111_v11 = vadd.s32 88, %v1099_v1  ;;  %v1114_v12 = vadd.s32 80, %v1099_v1  ;;  %v1117_v13 = vadd.s32 72, %v1099_v1  ;;  %v1120_v14 = vadd.s32 64, %v1099_v1  ;;  %s587_s12 = scalar_lea.sflag [#allocation4], %s1084_s15 }
  0x28   : > { %v1101_v2 = vld [vmem:[%s199_s28] sm:$0x3f]  ;;  %v1125_v18 = vadd.s32 56, %v1099_v1  ;;  %v1128_v19 = vadd.s32 48, %v1099_v1  ;;  %v1131_v20 = vadd.s32 40, %v1099_v1  ;;  %v1134_v21 = vadd.s32 32, %v1099_v1 }
  0x29   : > { %vm794_vm0 = vcmp.lt.s32.totalorder %v1101_v2, 0  ;;  %v795_v3 = vceil.f32 %v1101_v2  ;;  %v796_v4 = vfloor.f32 %v1101_v2  ;;  %v1137_v22 = vadd.s32 24, %v1099_v1  ;;  %s917_s8 = sshra.s32 %s604_s7, 4  ;;  %s923_s19 = scalar_lea.hbm %s1350_s2, 32  ;;  %s918_s8 = int_to_ptr.hbm [resolvable:$true] %s917_s8 }
  0x2a   : > { %s919_s16 = scalar_lea.hbm %s918_s8, 16  ;;  %p924_p8 = scmp.lt.s32.totalorder %s918_s8, %s1350_s2 }
  0x2b   : > { %v797_v5 = vsel %vm794_vm0, %v795_v3, %v796_v4  ;;  %p920_p5 = scmp.ne.s32.totalorder %s918_s8, %s919_s16  ;;  %p925_p10 = scmp.lt.s32.totalorder %s923_s19, %s919_s16 }
  0x2c   : > { %v798_v7 = vcvt.f32.s32 %v797_v5 }
  0x2d   : > { %p921_p6 = pnand %p920_p5, %p1061_p9  ;;  %p926_p13 = por %p925_p10, %p924_p8 }
  0x2e   : > { %v1122_v15 = vperm.slane %v798_v7, 0  ;;  %v300_v16 = vadd.s32 4, %v798_v7  ;;  %v392_v17 = vadd.s32 12, %v798_v7 }
  0x2f   : > { %p922_p7 = pneg %p921_p6 }
  0x30   : > { %v1139_v23 = vperm.slane %v300_v16, 1  ;;  %v1141_v24 = vperm.slane %v392_v17, 2  ;;  %vm243_vm1 = vcmp.eq.s32.totalorder %v223_v6, %v1122_v15  ;;  %vm242_vm2 = vcmp.eq.s32.totalorder %v222_v8, %v1122_v15 }
  0x31   : > { %v729_v26 = vsel %vm243_vm1, 1.0, %v989_v25  ;;  %v728_v27 = vsel %vm242_vm2, 1.0, %v989_v25  ;;  %vm241_vm3 = vcmp.eq.s32.totalorder %v221_v9, %v1122_v15  ;;  %vm240_vm4 = vcmp.eq.s32.totalorder %v220_v10, %v1122_v15  ;;  %p927_p0 = pnand %p926_p13, %p922_p7 }
  0x32   : > { %v297_v28 = vmul.f32 -1.0, %v729_v26  ;;  %vm317_vm5 = vcmp.eq.s32.totalorder %v223_v6, %v1139_v23  ;;  %vm409_vm6 = vcmp.eq.s32.totalorder %v223_v6, %v1141_v24  ;;  %v296_v29 = vmul.f32 -1.0, %v728_v27 }
  0x33   : > { %v747_v30 = vsel %vm317_vm5, 1.0, %v989_v25  ;;  %v765_v31 = vsel %vm409_vm6, 1.0, %v989_v25  ;;  %vm316_vm7 = vcmp.eq.s32.totalorder %v222_v8, %v1139_v23  ;;  %vm408_vm8 = vcmp.eq.s32.totalorder %v222_v8, %v1141_v24 }
  0x34   : > { %v371_v32 = vmul.f32 -1.0, %v747_v30  ;;  %v463_v33 = vmul.f32 -1.0, %v765_v31  ;;  %v746_v34 = vsel %vm316_vm7, 1.0, %v989_v25  ;;  %v764_v35 = vsel %vm408_vm8, 1.0, %v989_v25 }
  0x35   : > { %v370_v36 = vmul.f32 -1.0, %v746_v34  ;;  %v462_v37 = vmul.f32 -1.0, %v764_v35  ;;  %v727_v38 = vsel %vm241_vm3, 1.0, %v989_v25  ;;  %vm315_vm9 = vcmp.eq.s32.totalorder %v221_v9, %v1139_v23 }
  0x36   : > { %v389_v39 = vadd.f32 %v371_v32, %v297_v28  ;;  %v295_v40 = vmul.f32 -1.0, %v727_v38  ;;  %v745_v41 = vsel %vm315_vm9, 1.0, %v989_v25  ;;  %vm407_vm10 = vcmp.eq.s32.totalorder %v221_v9, %v1141_v24 }
  0x37   : > { %v388_v42 = vadd.f32 %v370_v36, %v296_v29  ;;  %v369_v43 = vmul.f32 -1.0, %v745_v41  ;;  %v763_v44 = vsel %vm407_vm10, 1.0, %v989_v25  ;;  %v726_v45 = vsel %vm240_vm4, 1.0, %v989_v25 }
  0x38   : > { %v481_v46 = vadd.f32 %v463_v33, %v389_v39  ;;  %v461_v47 = vmul.f32 -1.0, %v763_v44  ;;  %v294_v48 = vmul.f32 -1.0, %v726_v45  ;;  %vm314_vm11 = vcmp.eq.s32.totalorder %v220_v10, %v1139_v23 }
  0x39   : > { %v480_v49 = vadd.f32 %v462_v37, %v388_v42  ;;  %v387_v50 = vadd.f32 %v369_v43, %v295_v40  ;;  %v744_v51 = vsel %vm314_vm11, 1.0, %v989_v25  ;;  %vm406_vm12 = vcmp.eq.s32.totalorder %v220_v10, %v1141_v24 }
  0x3a   : > { %538 = vmatpush.msra.mxu0 %v481_v46  ;;  %778 = vmatpush.msra.mxu2 %v481_v46  ;;  %v368_v52 = vmul.f32 -1.0, %v744_v51  ;;  %v762_v53 = vsel %vm406_vm12, 1.0, %v989_v25  ;;  %vm239_vm13 = vcmp.eq.s32.totalorder %v1111_v11, %v1122_v15  ;;  %vm313_vm14 = vcmp.eq.s32.totalorder %v1111_v11, %v1139_v23 }
  0x3b   : > { %v479_v54 = vadd.f32 %v461_v47, %v387_v50  ;;  %v460_v55 = vmul.f32 -1.0, %v762_v53  ;;  %v725_v56 = vsel %vm239_vm13, 1.0, %v989_v25  ;;  %v743_v57 = vsel %vm313_vm14, 1.0, %v989_v25 }
  0x3c   : > { %539 = vmatpush.msra.mxu0 %v480_v49  ;;  %779 = vmatpush.msra.mxu2 %v480_v49  ;;  %v386_v58 = vadd.f32 %v368_v52, %v294_v48  ;;  %v293_v59 = vmul.f32 -1.0, %v725_v56  ;;  %v367_v60 = vmul.f32 -1.0, %v743_v57  ;;  %vm405_vm15 = vcmp.eq.s32.totalorder %v1111_v11, %v1141_v24 }
  0x3d   : > { %v761_v61 = vsel %vm405_vm15, 1.0, %v989_v25  ;;  %vm238_vm0 = vcmp.eq.s32.totalorder %v1114_v12, %v1122_v15  ;;  %vm312_vm1 = vcmp.eq.s32.totalorder %v1114_v12, %v1139_v23  ;;  %vm404_vm2 = vcmp.eq.s32.totalorder %v1114_v12, %v1141_v24 }
  0x3e   : > { %540 = vmatpush.msra.mxu0 %v479_v54  ;;  %780 = vmatpush.msra.mxu2 %v479_v54  ;;  %v478_v62 = vadd.f32 %v460_v55, %v386_v58  ;;  %v385_v63 = vadd.f32 %v367_v60, %v293_v59  ;;  %v459_v0 = vmul.f32 -1.0, %v761_v61  ;;  %v724_v3 = vsel %vm238_vm0, 1.0, %v989_v25  ;;  %v1243_v60 = vld [vmem:[%s1088_s20 + $0x8] sm:$0xff] }
  0x3f   : > { %v292_v4 = vmul.f32 -1.0, %v724_v3  ;;  %v742_v5 = vsel %vm312_vm1, 1.0, %v989_v25  ;;  %v760_v6 = vsel %vm404_vm2, 1.0, %v989_v25  ;;  %vm237_vm3 = vcmp.eq.s32.totalorder %v1117_v13, %v1122_v15 }
  0x40   : > { %541 = vmatpush.msra.mxu0 %v478_v62  ;;  %781 = vmatpush.msra.mxu2 %v478_v62  ;;  %v477_v7 = vadd.f32 %v459_v0, %v385_v63  ;;  %v366_v8 = vmul.f32 -1.0, %v742_v5  ;;  %v458_v9 = vmul.f32 -1.0, %v760_v6  ;;  %v723_v10 = vsel %vm237_vm3, 1.0, %v989_v25 }
  0x41   : > { %v291_v11 = vmul.f32 -1.0, %v723_v10  ;;  %vm311_vm4 = vcmp.eq.s32.totalorder %v1117_v13, %v1139_v23  ;;  %vm403_vm5 = vcmp.eq.s32.totalorder %v1117_v13, %v1141_v24  ;;  %vm236_vm6 = vcmp.eq.s32.totalorder %v1120_v14, %v1122_v15 }
  0x42   : > { %542 = vmatpush.msra.mxu0 %v477_v7  ;;  %782 = vmatpush.msra.mxu2 %v477_v7  ;;  %v384_v12 = vadd.f32 %v366_v8, %v292_v4  ;;  %v741_v16 = vsel %vm311_vm4, 1.0, %v989_v25  ;;  %v759_v17 = vsel %vm403_vm5, 1.0, %v989_v25  ;;  %v722_v26 = vsel %vm236_vm6, 1.0, %v989_v25 }
  0x43   : > { %v365_v27 = vmul.f32 -1.0, %v741_v16  ;;  %v457_v28 = vmul.f32 -1.0, %v759_v17  ;;  %v290_v29 = vmul.f32 -1.0, %v722_v26  ;;  %vm310_vm7 = vcmp.eq.s32.totalorder %v1120_v14, %v1139_v23 }
  0x44   : > { %v476_v30 = vadd.f32 %v458_v9, %v384_v12  ;;  %v740_v13 = vsel %vm310_vm7, 1.0, %v989_v25  ;;  %vm402_vm8 = vcmp.eq.s32.totalorder %v1120_v14, %v1141_v24  ;;  %vm235_vm9 = vcmp.eq.s32.totalorder %v1125_v18, %v1122_v15 }
  0x45   : > { %v383_v31 = vadd.f32 %v365_v27, %v291_v11  ;;  %v364_v32 = vmul.f32 -1.0, %v740_v13  ;;  %v758_v33 = vsel %vm402_vm8, 1.0, %v989_v25  ;;  %v721_v34 = vsel %vm235_vm9, 1.0, %v989_v25 }
  0x46   : > { %543 = vmatpush.msra.mxu0 %v476_v30  ;;  %783 = vmatpush.msra.mxu2 %v476_v30  ;;  %v456_v35 = vmul.f32 -1.0, %v758_v33  ;;  %v289_v36 = vmul.f32 -1.0, %v721_v34  ;;  %vm309_vm10 = vcmp.eq.s32.totalorder %v1125_v18, %v1139_v23  ;;  %vm401_vm11 = vcmp.eq.s32.totalorder %v1125_v18, %v1141_v24 }
  0x47   : > { %v475_v14 = vadd.f32 %v457_v28, %v383_v31  ;;  %v382_v37 = vadd.f32 %v364_v32, %v290_v29  ;;  %v739_v38 = vsel %vm309_vm10, 1.0, %v989_v25  ;;  %v757_v39 = vsel %vm401_vm11, 1.0, %v989_v25  ;;  %v1268_v32 = vld [vmem:[%s1088_s20 + $0x18] sm:$0xff] }
  0x48   : > { %v363_v40 = vmul.f32 -1.0, %v739_v38  ;;  %v455_v41 = vmul.f32 -1.0, %v757_v39  ;;  %vm234_vm12 = vcmp.eq.s32.totalorder %v1128_v19, %v1122_v15  ;;  %vm308_vm13 = vcmp.eq.s32.totalorder %v1128_v19, %v1139_v23 }
  0x49   : > { %544 = vmatpush.msra.mxu0 %v475_v14  ;;  %784 = vmatpush.msra.mxu2 %v475_v14  ;;  %v474_v42 = vadd.f32 %v456_v35, %v382_v37  ;;  %v720_v43 = vsel %vm234_vm12, 1.0, %v989_v25  ;;  %v738_v18 = vsel %vm308_vm13, 1.0, %v989_v25  ;;  %vm400_vm14 = vcmp.eq.s32.totalorder %v1128_v19, %v1141_v24 }
  0x4a   : > { %v381_v44 = vadd.f32 %v363_v40, %v289_v36  ;;  %v288_v45 = vmul.f32 -1.0, %v720_v43  ;;  %v362_v46 = vmul.f32 -1.0, %v738_v18  ;;  %v756_v47 = vsel %vm400_vm14, 1.0, %v989_v25 }
  0x4b   : > { %545 = vmatpush.msra.mxu0 %v474_v42  ;;  %785 = vmatpush.msra.mxu2 %v474_v42  ;;  %v454_v48 = vmul.f32 -1.0, %v756_v47  ;;  %vm233_vm15 = vcmp.eq.s32.totalorder %v1131_v20, %v1122_v15  ;;  %vm307_vm0 = vcmp.eq.s32.totalorder %v1131_v20, %v1139_v23  ;;  %vm399_vm1 = vcmp.eq.s32.totalorder %v1131_v20, %v1141_v24 }
  0x4c   : > { %v473_v49 = vadd.f32 %v455_v41, %v381_v44  ;;  %v380_v50 = vadd.f32 %v362_v46, %v288_v45  ;;  %v719_v19 = vsel %vm233_vm15, 1.0, %v989_v25  ;;  %v737_v51 = vsel %vm307_vm0, 1.0, %v989_v25 }
  0x4d   : > { %v287_v52 = vmul.f32 -1.0, %v719_v19  ;;  %v361_v53 = vmul.f32 -1.0, %v737_v51  ;;  %v755_v54 = vsel %vm399_vm1, 1.0, %v989_v25  ;;  %vm232_vm2 = vcmp.eq.s32.totalorder %v1134_v21, %v1122_v15 }
  0x4e   : > { %546 = vmatpush.msra.mxu0 %v473_v49  ;;  %786 = vmatpush.msra.mxu2 %v473_v49  ;;  %v472_v55 = vadd.f32 %v454_v48, %v380_v50  ;;  %v453_v56 = vmul.f32 -1.0, %v755_v54  ;;  %v718_v20 = vsel %vm232_vm2, 1.0, %v989_v25  ;;  %vm306_vm3 = vcmp.eq.s32.totalorder %v1134_v21, %v1139_v23 }
  0x4f   : > { %v379_v57 = vadd.f32 %v361_v53, %v287_v52  ;;  %v286_v58 = vmul.f32 -1.0, %v718_v20  ;;  %v736_v59 = vsel %vm306_vm3, 1.0, %v989_v25  ;;  %vm398_vm4 = vcmp.eq.s32.totalorder %v1134_v21, %v1141_v24 }
  0x50   : > { %547 = vmatpush.msra.mxu0 %v472_v55  ;;  %787 = vmatpush.msra.mxu2 %v472_v55  ;;  %v360_v61 = vmul.f32 -1.0, %v736_v59  ;;  %v754_v62 = vsel %vm398_vm4, 1.0, %v989_v25  ;;  %v990_v3 = vmov 13   ;;  %v991_v4 = vmov 12  }
  0x51   : > { %v471_v63 = vadd.f32 %v453_v56, %v379_v57  ;;  %v452_v0 = vmul.f32 -1.0, %v754_v62  ;;  %870 = vset.pattern.permute.xlu1 %v990_v3  ;;  %869 = vset.pattern.permute.xlu0 %v991_v4  ;;  %vm231_vm5 = vcmp.eq.s32.totalorder %v1137_v22, %v1122_v15  ;;  %vm305_vm6 = vcmp.eq.s32.totalorder %v1137_v22, %v1139_v23  ;;  %v202_v62 = vld [vmem:[%s1088_s20] sm:$0xff] }
  0x52   : > { %v378_v21 = vadd.f32 %v360_v61, %v286_v58  ;;  %v717_v5 = vsel %vm231_vm5, 1.0, %v989_v25  ;;  %v735_v6 = vsel %vm305_vm6, 1.0, %v989_v25  ;;  %vm397_vm7 = vcmp.eq.s32.totalorder %v1137_v22, %v1141_v24  ;;  %500 = vperm.xlu1 %870, %v1243_v60   ;;  %486 = vperm.xlu0 %869, %v1243_v60  }
  0x53   : > { %548 = vmatpush.msra.mxu0 %v471_v63  ;;  %788 = vmatpush.msra.mxu2 %v471_v63  ;;  %v285_v7 = vmul.f32 -1.0, %v717_v5  ;;  %v359_v8 = vmul.f32 -1.0, %v735_v6  ;;  %v753_v9 = vsel %vm397_vm7, 1.0, %v989_v25  ;;  %v210_v10 = vadd.s32 16, %v1099_v1 }
  0x54   : > { %v470_v11 = vadd.f32 %v452_v0, %v378_v21  ;;  %v451_v12 = vmul.f32 -1.0, %v753_v9  ;;  %v209_v16 = vadd.s32 8, %v1099_v1  ;;  %v225_v17 = vadd.s32 136, %v1099_v1 }
  0x55   : > { %v377_v22 = vadd.f32 %v359_v8, %v285_v7  ;;  %vm230_vm8 = vcmp.eq.s32.totalorder %v210_v10, %v1122_v15  ;;  %vm304_vm9 = vcmp.eq.s32.totalorder %v210_v10, %v1139_v23  ;;  %vm396_vm10 = vcmp.eq.s32.totalorder %v210_v10, %v1141_v24 }
  0x56   : > { %549 = vmatpush.msra.mxu0 %v470_v11  ;;  %789 = vmatpush.msra.mxu2 %v470_v11  ;;  %v716_v26 = vsel %vm230_vm8, 1.0, %v989_v25  ;;  %v734_v27 = vsel %vm304_vm9, 1.0, %v989_v25  ;;  %v752_v28 = vsel %vm396_vm10, 1.0, %v989_v25  ;;  %vm229_vm11 = vcmp.eq.s32.totalorder %v209_v16, %v1122_v15 }
  0x57   : > { %v469_v29 = vadd.f32 %v451_v12, %v377_v22  ;;  %v284_v30 = vmul.f32 -1.0, %v716_v26  ;;  %v358_v13 = vmul.f32 -1.0, %v734_v27  ;;  %v450_v31 = vmul.f32 -1.0, %v752_v28 }
  0x58   : > { %v715_v33 = vsel %vm229_vm11, 1.0, %v989_v25  ;;  %vm303_vm12 = vcmp.eq.s32.totalorder %v209_v16, %v1139_v23  ;;  %vm395_vm13 = vcmp.eq.s32.totalorder %v209_v16, %v1141_v24  ;;  %vm245_vm14 = vcmp.eq.s32.totalorder %v225_v17, %v1122_v15 }
  0x59   : > { %550 = vmatpush.msra.mxu0 %v469_v29  ;;  %790 = vmatpush.msra.mxu2 %v469_v29  ;;  %v376_v34 = vadd.f32 %v358_v13, %v284_v30  ;;  %v283_v35 = vmul.f32 -1.0, %v715_v33  ;;  %v733_v36 = vsel %vm303_vm12, 1.0, %v989_v25  ;;  %v751_v14 = vsel %vm395_vm13, 1.0, %v989_v25 }
  0x5a   : > { %v357_v37 = vmul.f32 -1.0, %v733_v36  ;;  %v449_v38 = vmul.f32 -1.0, %v751_v14  ;;  %v731_v39 = vsel %vm245_vm14, 1.0, %v989_v25  ;;  %vm319_vm15 = vcmp.eq.s32.totalorder %v225_v17, %v1139_v23  ;;  %504 = vperm.xlu1 %870, %v1268_v32   ;;  %491 = vperm.xlu0 %869, %v1268_v32  }
  0x5b   : > { %v468_v40 = vadd.f32 %v450_v31, %v376_v34  ;;  %v299_v41 = vmul.f32 -1.0, %v731_v39  ;;  %v749_v42 = vsel %vm319_vm15, 1.0, %v989_v25  ;;  %vm411_vm0 = vcmp.eq.s32.totalorder %v225_v17, %v1141_v24 }
  0x5c   : > { %v375_v43 = vadd.f32 %v357_v37, %v283_v35  ;;  %v373_v18 = vmul.f32 -1.0, %v749_v42  ;;  %v767_v44 = vsel %vm411_vm0, 1.0, %v989_v25  ;;  %vm534_vm1 = vcmask 1046528  }
  0x5d   : > { %551 = vmatpush.msra.mxu0 %v468_v40  ;;  %791 = vmatpush.msra.mxu2 %v468_v40  ;;  %v465_v45 = vmul.f32 -1.0, %v767_v44  ;;  %vm228_vm2 = vcmp.eq.s32.totalorder %v1099_v1, %v1122_v15  ;;  %vm302_vm3 = vcmp.eq.s32.totalorder %v1099_v1, %v1139_v23  ;;  %vm394_vm4 = vcmp.eq.s32.totalorder %v1099_v1, %v1141_v24 }
  0x5e   : > { %v467_v46 = vadd.f32 %v449_v38, %v375_v43  ;;  %v391_v47 = vadd.f32 %v373_v18, %v299_v41  ;;  %v714_v48 = vsel %vm228_vm2, 1.0, %v989_v25  ;;  %v732_v49 = vsel %vm302_vm3, 1.0, %v989_v25 }
  0x5f   : > { %v282_v50 = vmul.f32 -1.0, %v714_v48  ;;  %v356_v19 = vmul.f32 -1.0, %v732_v49  ;;  %v750_v51 = vsel %vm394_vm4, 1.0, %v989_v25  ;;  %v224_v52 = vadd.s32 128, %v1099_v1 }
  0x60   : > { %552 = vmatpush.msra.mxu0 %v467_v46  ;;  %792 = vmatpush.msra.mxu2 %v467_v46  ;;  %v483_v53 = vadd.f32 %v465_v45, %v391_v47  ;;  %v448_v54 = vmul.f32 -1.0, %v750_v51  ;;  %v992_v56 = vmov 14   ;;  %vm529_vm8 = vcmask 121856  }
  0x61   : > { %v374_v55 = vadd.f32 %v356_v19, %v282_v50  ;;  %vm244_vm5 = vcmp.eq.s32.totalorder %v224_v52, %v1122_v15  ;;  %vm318_vm6 = vcmp.eq.s32.totalorder %v224_v52, %v1139_v23  ;;  %vm410_vm7 = vcmp.eq.s32.totalorder %v224_v52, %v1141_v24  ;;  %871 = vset.pattern.permute.xlu2 %v992_v56  ;;  %v204_v23 = vld [vmem:[%s1088_s20 + $0x10] sm:$0xff] }
  0x62   : > { %768 = vmatpush.msk.msra.mxu1 %vm534_vm1, %v483_v53  ;;  %v730_v20 = vsel %vm244_vm5, 1.0, %v989_v25  ;;  %v748_v1 = vsel %vm318_vm6, 1.0, %v989_v25  ;;  %v766_v57 = vsel %vm410_vm7, 1.0, %v989_v25  ;;  %515 = vperm.xlu2 %871, %v1243_v60   ;;  %v507_v3 = vperm.slane %v1101_v2, 4 }
  0x63   : > { %v466_v58 = vadd.f32 %v448_v54, %v374_v55  ;;  %v298_v59 = vmul.f32 -1.0, %v730_v20  ;;  %v372_v61 = vmul.f32 -1.0, %v748_v1  ;;  %v464_v15 = vmul.f32 -1.0, %v766_v57  ;;  %872 = vset.pattern.permute.xlu0 %v992_v56 }
  0x64   : > { %v494_v4 = vperm.slane %v1101_v2, 3  ;;  %v522_v7 = vperm.slane %v1101_v2, 5 }
  0x65   : > { %553 = vmatpush.msra.mxu0 %v466_v58  ;;  %793 = vmatpush.msra.mxu2 %v466_v58  ;;  %v390_v24 = vadd.f32 %v372_v61, %v298_v59 }
  0x66   : > { %554 = vmatmul.f32.vlgmr.msra.gmra.mxu0 %v202_v62  ;;  %557 = vmatmul.f32.vlgmr.msra.gmra.mxu2 %v204_v23 }
  0x67   : > { %v482_v63 = vadd.f32 %v464_v15, %v390_v24 }
  0x69   : > { %576 = vmatpush.msra.mxu1 %v482_v63 }
  0x6a   : > { %769 = vmatmul.msk.f32.vlgmr.msra.gmra.mxu1 %vm529_vm8, %v1243_v60  ;;  %519 = vperm.xlu2 %871, %v1268_v32  }
  0x72   : > { %770 = vmatmul.msk.f32.gmra.mxu1 %vm529_vm8, %v1268_v32 }
  0xbc   : > { %v516_v21 = vpop.permute.xlu2 %515 }
  0xbd   : > { %v523_v10 = vsub.f32 %v516_v21, %v522_v7 }
  0xbf   : > { %v525_v16 = vand.u32 2147483647, %v523_v10 }
  0xc4   : > { %v501_v25 = vpop.permute.xlu1 %500  ;;  %v487_v0 = vpop.permute.xlu0 %486 }
  0xc5   : > { %v508_v5 = vsub.f32 %v501_v25, %v507_v3  ;;  %v495_v6 = vsub.f32 %v487_v0, %v494_v4  ;;  %v520_v26 = vpop.permute.xlu2 %519 }
  0xc6   : > { %v524_v29 = vsub.f32 %v520_v26, %v522_v7 }
  0xc7   : > { %v510_v8 = vand.u32 2147483647, %v508_v5  ;;  %v497_v9 = vand.u32 2147483647, %v495_v6 }
  0xc8   : > { %v526_v32 = vand.u32 2147483647, %v524_v29 }
  0xc9   : > { %v512_v12 = vadd.f32 %v510_v8, %v497_v9 }
  0xcb   : > { %v527_v30 = vadd.f32 %v525_v16, %v512_v12 }
  0xcc   : > { %v505_v60 = vpop.permute.xlu1 %504  ;;  %v492_v11 = vpop.permute.xlu0 %491 }
  0xcd   : > { %v509_v17 = vsub.f32 %v505_v60, %v507_v3  ;;  %v496_v22 = vsub.f32 %v492_v11, %v494_v4 }
  0xcf   : > { %v511_v27 = vand.u32 2147483647, %v509_v17  ;;  %v498_v28 = vand.u32 2147483647, %v496_v22 }
  0xd1   : > { %v513_v2 = vadd.f32 %v511_v27, %v498_v28 }
  0xd3   : > { %v528_v36 = vadd.f32 %v526_v32, %v513_v2 }
  0xe3   : > { %v555_v13 = vpop.f32.mrf.mxu0 }
  0xe4   : > { %v556_v31 = vadd.f32 %v555_v13, %v527_v30 }
  0xe7   : > { %v578_v33 = vpop.f32.mrf.mxu1 }
  0xe8   : > { %v579_v34 = vadd.f32 %v578_v33, %v556_v31 }
  0xe9   : > { %v558_v35 = vpop.f32.mrf.mxu2 }
  0xea   : > { %584 = vst [vmem:[%s195_s5] sm:$0xff] %v579_v34  ;;  %v559_v14 = vadd.f32 %v558_v35, %v528_v36 }
  0xef   : > { %v581_v37 = vpop.f32.mrf.mxu1 }
  0xf0   : > { %v582_v38 = vadd.f32 %v581_v37, %v559_v14 }
  0xf2   : > { %585 = vst [vmem:[%s195_s5 + $0x8] sm:$0xff] %v582_v38 }
  0xf3   : > { %930 = shalt.err (!%p927_p0)
}
  0xf4   : > { %s993_s15 = smov 128   ;;  %s994_s27 = smov 8  }
  0xf5   : > { %801 = dma.vmem_to_hbm [thread:$0]  (%p1061_p9), %s602_s6, 256, %s604_s7, %s587_s12, %s993_s15, %s993_s15, %s994_s27  }
  0xf6 PF: > { %s618_s28 = sand.u32 1, %s965_s9   ;;  %p808_p1 = pnand %p706_p12, %p1068_p11 }
  0xf7   : > { %s619_s21 = scalar_lea.sflag [#allocation4], %s618_s28 }
  0xf8   : > { %p809_p2 = pneg %p808_p1 }
  0xfa   : > { %960 = dma.done.wait (%p809_p2), %s619_s21, 256  }
  0xfb   : > { %962 = vsyncadd (%p809_p2), %s619_s21, 4294967040  ;;  %s18_s14 = sadd.s32 1, %s985_s14   ;;  %s1355_s9 = smov %s969_s10 }
  0xfc   : > { %p15_p3 = scmp.ge.s32.totalorder %s18_s14, 4   ;;  %s1356_s10 = smov %s973_s11 }
  0xfd   : > { %s1357_s11 = smov %s1066_s23  ;;  %s1358_s12 = smov %s981_s13 }
  0xfe   : > { %s1359_s13 = smov %s1361_s17  ;;  %17 = sbr.rel (!%p15_p3) target bundleno = 6 (0x6), region = 76 }
 0x103   :  { %625 = vsyncpa [#allocation3], 1 }
 0x104   :  { %627 = vsyncpa [#allocation3 + $0x1], 1 }
 0x105   :  { %628 = vsyncpa [#allocation4], 1 }
 0x106   :  { %630 = vsyncpa [#allocation4 + $0x1], 1 }

</bundles_post_ra>
